<compile_context>
chip_gen: v6e
topology: v6e:2x2x1
jax: 0.10.0
libtpu: 0.0.40
codegen_flags: <defaults>
</compile_context>

<pallas_src>
import functools
import math

import jax
import jax.numpy as jnp
from jax.experimental import pallas as pl
from jax.experimental.pallas import tpu as pltpu


# ----------------------------- config (synthetic, ESM-like) -----------------------------
B = 2                 # batch
S = 8                 # sequence length
HIDDEN = 32           # config.hidden_size
VOCAB = 33            # config.vocab_size
LN_EPS = 1e-12        # config.layer_norm_eps

_INV_SQRT2 = 1.0 / math.sqrt(2.0)


def _round_up(x, m):
    return ((x + m - 1) // m) * m


# ----------------------------------- Pallas kernel --------------------------------------
def esm_lm_head_kernel(x_ref, wd_ref, bd_ref, gamma_ref, beta_ref, wdec_ref, bias_ref,
                       out_ref, *, hidden, eps):
    """One token tile: dense -> gelu -> layernorm -> decoder (+bias).

    Shapes (all lane-padded):
      x_ref     (TM, Hp) bf16   wd_ref  (Hp, Hp) bf16   bd_ref   (1, Hp) f32
      gamma_ref (1, Hp)  f32    beta_ref (1, Hp) f32
      wdec_ref  (Hp, Vp) bf16   bias_ref (1, Vp) f32    out_ref  (TM, Vp) f32
    Padded hidden columns of x/wd/bd/gamma/beta and padded hidden rows of wdec are zero,
    so padded lanes stay exactly zero throughout the math that matters.
    """
    x = x_ref[...]

    # ---- dense: x @ Wd^T + b  (Wd pre-transposed in prep) ----  MXU bf16 in / f32 acc
    h = jnp.dot(x, wd_ref[...], preferred_element_type=jnp.float32) + bd_ref[...]

    # ---- exact ESM gelu: x * 0.5 * (1 + erf(x / sqrt(2))) ----  EUP/VPU, f32
    h = h * 0.5 * (1.0 + jax.lax.erf(h * _INV_SQRT2))

    # ---- LayerNorm over the TRUE hidden size (no lane mask needed: padded h == 0) ----
    inv_h = 1.0 / float(hidden)
    mean = jnp.sum(h, axis=-1, keepdims=True) * inv_h
    var = jnp.maximum(jnp.sum(h * h, axis=-1, keepdims=True) * inv_h - mean * mean, 0.0)
    y = (h - mean) * jax.lax.rsqrt(var + eps) * gamma_ref[...] + beta_ref[...]

    # ---- decoder: y @ Wdec^T + bias ----  MXU bf16 in / f32 acc
    logits = jnp.dot(y.astype(wdec_ref.dtype), wdec_ref[...],
                     preferred_element_type=jnp.float32) + bias_ref[...]
    out_ref[...] = logits.astype(out_ref.dtype)                 # lane-dense store


# --------------------------- one-time parameter preparation -----------------------------
def prepare_esm_lm_head_params(w_dense, b_dense, ln_gamma, ln_beta, w_decoder, dec_bias,
                               *, weight_dtype=jnp.bfloat16):
    """Hoisted out of the hot path: transpose to (in, out), pad to lane multiples, cast.

    w_dense: (H, H) PyTorch Linear weight (out, in); b_dense: (H,)
    w_decoder: (V, H) PyTorch Linear weight (out, in); dec_bias: (V,)
    """
    h = w_dense.shape[0]
    v = w_decoder.shape[0]
    hp = _round_up(h, 128)
    vp = _round_up(v, 128)
    f32 = jnp.float32
    wd = jnp.zeros((hp, hp), weight_dtype).at[:h, :h].set(w_dense.T.astype(weight_dtype))
    wdec = jnp.zeros((hp, vp), weight_dtype).at[:h, :v].set(w_decoder.T.astype(weight_dtype))
    bd = jnp.zeros((1, hp), f32).at[:, :h].set(b_dense.reshape(1, h).astype(f32))
    gamma = jnp.zeros((1, hp), f32).at[:, :h].set(ln_gamma.reshape(1, h).astype(f32))
    beta = jnp.zeros((1, hp), f32).at[:, :h].set(ln_beta.reshape(1, h).astype(f32))
    bias = jnp.zeros((1, vp), f32).at[:, :v].set(dec_bias.reshape(1, v).astype(f32))
    return dict(hidden=h, vocab=v, h_pad=hp, v_pad=vp, weight_dtype=weight_dtype,
                wd=wd, bd=bd, gamma=gamma, beta=beta, wdec=wdec, bias=bias)


# ------------------------------------ heuristics -----------------------------------------
def _choose_tm(bs):
    """Token-tile size (sublane multiple). Large tiles at real sizes; >=2 grid steps when small."""
    if bs >= 4096:
        return 1024
    if bs >= 1024:
        return 512
    if bs >= 256:
        return 256
    # small: keep (at least) 2 grid steps so the "parallel" axis splits across v7x's 2 TCs
    return max(8, _round_up(pl.cdiv(bs, 2), 8))


def _vmem_limit(h_pad, v_pad, tm, weight_dtype, single_buffer):
    """Buffer-count-aware VMEM budget, capped by the physical per-core VMEM."""
    try:
        phys = int(pltpu.get_tpu_info().vmem_capacity_bytes)
    except Exception:
        phys = 64 << 20  # most restrictive generation (v7x per-TC VMEM)
    bpe = jnp.dtype(weight_dtype).itemsize
    wbuf = 1 if single_buffer else 2
    resident = wbuf * (bpe * (h_pad * h_pad + h_pad * v_pad) + 4 * (3 * h_pad + v_pad))
    tiles = 2 * bpe * tm * h_pad + 2 * 4 * tm * v_pad        # double-buffered in/out tiles
    want = resident + tiles + (2 << 20)
    return int(max(8 << 20, min(phys - (8 << 20), want)))


# ------------------------------------- wrapper -------------------------------------------
def esm_lm_head(features, params, *, eps=LN_EPS):
    """features (B, S, H) -> logits (B, S, V) f32, using prepare_esm_lm_head_params output."""
    b, s, h = features.shape
    assert h == params["hidden"]
    v = params["vocab"]
    hp, vp = params["h_pad"], params["v_pad"]
    wdt = params["weight_dtype"]
    bs = b * s

    tm = _choose_tm(bs)
    m_pad = _round_up(bs, tm)
    grid = (m_pad // tm,)

    # stream activations in the matmul dtype; skip the pad pass entirely when aligned
    x = features.reshape(bs, h).astype(wdt)
    if (m_pad, hp) != (bs, h):
        x = jnp.zeros((m_pad, hp), wdt).at[:bs, :h].set(x)

    kernel = functools.partial(esm_lm_head_kernel, hidden=h, eps=eps)

    def build(single_buffer):
        resident_kwargs = {}
        if single_buffer and hasattr(pl, "Buffered"):
            # constant index_map -> double-buffering these is pure VMEM waste
            resident_kwargs["pipeline_mode"] = pl.Buffered(1)
        in_specs = [
            pl.BlockSpec((tm, hp), lambda i: (i, 0)),                       # token tile
            pl.BlockSpec((hp, hp), lambda i: (0, 0), **resident_kwargs),    # Wd^T (resident)
            pl.BlockSpec((1, hp), lambda i: (0, 0), **resident_kwargs),     # dense bias
            pl.BlockSpec((1, hp), lambda i: (0, 0), **resident_kwargs),     # LN gamma
            pl.BlockSpec((1, hp), lambda i: (0, 0), **resident_kwargs),     # LN beta
            pl.BlockSpec((hp, vp), lambda i: (0, 0), **resident_kwargs),    # Wdec^T (resident)
            pl.BlockSpec((1, vp), lambda i: (0, 0), **resident_kwargs),     # decoder bias
        ]
        return pl.pallas_call(
            kernel,
            out_shape=jax.ShapeDtypeStruct((m_pad, vp), jnp.float32),
            grid=grid,
            in_specs=in_specs,
            out_specs=pl.BlockSpec((tm, vp), lambda i: (i, 0)),
            compiler_params=pltpu.CompilerParams(
                dimension_semantics=("parallel",),
                vmem_limit_bytes=_vmem_limit(hp, vp, tm, wdt, single_buffer)),
        )

    args = (x, params["wd"], params["bd"], params["gamma"], params["beta"],
            params["wdec"], params["bias"])
    try:
        out_pad = jax.block_until_ready(build(True)(*args))
    except Exception:
        # fallback for jax versions where pipeline_mode / Buffered(1) is unsupported
        out_pad = jax.block_until_ready(build(False)(*args))

    return out_pad[:bs, :v].reshape(b, s, v)


# --------------------------------- pure-JAX reference ------------------------------------
def esm_lm_head_ref(features, w_dense, b_dense, ln_gamma, ln_beta, w_decoder, dec_bias,
                    *, eps=LN_EPS, mm_dtype=jnp.float32):
    """PyTorch-semantics reference; mm_dtype controls the matmul operand precision."""
    f32 = jnp.float32
    x = jnp.dot(features.astype(mm_dtype), w_dense.T.astype(mm_dtype),
                preferred_element_type=f32) + b_dense
    x = x * 0.5 * (1.0 + jax.lax.erf(x * _INV_SQRT2))
    mean = x.mean(-1, keepdims=True)
    var = ((x - mean) ** 2).mean(-1, keepdims=True)
    x = (x - mean) / jnp.sqrt(var + eps)
    x = x * ln_gamma.reshape(1, 1, -1) + ln_beta.reshape(1, 1, -1)
    return jnp.dot(x.astype(mm_dtype), w_decoder.T.astype(mm_dtype),
                   preferred_element_type=f32) + dec_bias


# --------------------------------------- main --------------------------------------------
if __name__ == "__main__":
    key = jax.random.PRNGKey(0)
    k_f, k_wd, k_bd, k_g, k_b, k_wdec, k_bias = jax.random.split(key, 7)

    features = jax.random.normal(k_f, (B, S, HIDDEN), dtype=jnp.float32)
    w_dense = 0.05 * jax.random.normal(k_wd, (HIDDEN, HIDDEN), dtype=jnp.float32)
    b_dense = 0.05 * jax.random.normal(k_bd, (HIDDEN,), dtype=jnp.float32)
    ln_gamma = 1.0 + 0.1 * jax.random.normal(k_g, (HIDDEN,), dtype=jnp.float32)
    ln_beta = 0.1 * jax.random.normal(k_b, (HIDDEN,), dtype=jnp.float32)
    w_decoder = 0.05 * jax.random.normal(k_wdec, (VOCAB, HIDDEN), dtype=jnp.float32)
    dec_bias = 0.05 * jax.random.normal(k_bias, (VOCAB,), dtype=jnp.float32)

    params = prepare_esm_lm_head_params(w_dense, b_dense, ln_gamma, ln_beta,
                                        w_decoder, dec_bias)
    out = esm_lm_head(features, params)
    out = jax.block_until_ready(out)
    assert out.shape == (B, S, VOCAB) and out.dtype == jnp.float32
    assert bool(jnp.all(jnp.isfinite(out)))

    # matched-precision reference (bf16 matmul operands, f32 everywhere else)
    ref_bf16 = esm_lm_head_ref(features, w_dense, b_dense, ln_gamma, ln_beta,
                               w_decoder, dec_bias, mm_dtype=jnp.bfloat16)
    assert jnp.allclose(out, ref_bf16, rtol=1e-3, atol=1e-4), \
        "Pallas kernel mismatch vs matched-precision reference"

    # full-f32 PyTorch-semantics reference (loose: kernel uses bf16 matmul operands)
    ref_f32 = esm_lm_head_ref(features, w_dense, b_dense, ln_gamma, ln_beta,
                              w_decoder, dec_bias, mm_dtype=jnp.float32)
    assert jnp.allclose(out, ref_f32, rtol=2e-2, atol=2e-2), \
        "Pallas kernel mismatch vs f32 reference"

    print("KERNEL_OK")
</pallas_src>

<mosaic_0001>
module attributes {stable_mosaic.version = 11 : i64} {
  func.func @esm_lm_head_kernel(%arg0: i32, %arg1: memref<8x128xbf16, #tpu.memory_space<vmem>>, %arg2: memref<128x128xbf16, #tpu.memory_space<vmem>>, %arg3: memref<1x128xf32, #tpu.memory_space<vmem>>, %arg4: memref<1x128xf32, #tpu.memory_space<vmem>>, %arg5: memref<1x128xf32, #tpu.memory_space<vmem>>, %arg6: memref<128x128xbf16, #tpu.memory_space<vmem>>, %arg7: memref<1x128xf32, #tpu.memory_space<vmem>>, %arg8: memref<8x128xf32, #tpu.memory_space<vmem>>) attributes {dimension_semantics = [#tpu.dimension_semantics<parallel>], iteration_bounds = array<i64: 2>, scalar_prefetch = 0 : i64, scratch_operands = 0 : i64, tpu.core_type = #tpu.core_type<tc>, window_params = [{transform_indices = @transform_0, window_bounds = array<i64: 8, 128>}, {pipeline_mode = #tpu.pipeline_mode<synchronous>, transform_indices = @transform_1, window_bounds = array<i64: 128, 128>}, {pipeline_mode = #tpu.pipeline_mode<synchronous>, transform_indices = @transform_2, window_bounds = array<i64: 1, 128>}, {pipeline_mode = #tpu.pipeline_mode<synchronous>, transform_indices = @transform_3, window_bounds = array<i64: 1, 128>}, {pipeline_mode = #tpu.pipeline_mode<synchronous>, transform_indices = @transform_4, window_bounds = array<i64: 1, 128>}, {pipeline_mode = #tpu.pipeline_mode<synchronous>, transform_indices = @transform_5, window_bounds = array<i64: 128, 128>}, {pipeline_mode = #tpu.pipeline_mode<synchronous>, transform_indices = @transform_6, window_bounds = array<i64: 1, 128>}, {transform_indices = @transform_7, window_bounds = array<i64: 8, 128>}]} {
    %c0 = arith.constant 0 : index
    %c0_0 = arith.constant 0 : index
    %0 = vector.load %arg1[%c0, %c0_0] : memref<8x128xbf16, #tpu.memory_space<vmem>>, vector<8x128xbf16>
    %c0_1 = arith.constant 0 : index
    %c0_2 = arith.constant 0 : index
    %1 = vector.load %arg2[%c0_1, %c0_2] : memref<128x128xbf16, #tpu.memory_space<vmem>>, vector<128x128xbf16>
    %cst = arith.constant dense<0.000000e+00> : vector<8x128xf32>
    %2 = tpu.matmul %0, %1, %cst {dimension_numbers = #tpu.dot_dimension_numbers<[1], [0], [0], [1], [0, 0, 1, 1], [], []>} : vector<8x128xbf16>, vector<128x128xbf16>, vector<8x128xf32> -> vector<8x128xf32>
    %c0_3 = arith.constant 0 : index
    %c0_4 = arith.constant 0 : index
    %3 = vector.load %arg3[%c0_3, %c0_4] : memref<1x128xf32, #tpu.memory_space<vmem>>, vector<1x128xf32>
    %4 = vector.broadcast %3 : vector<1x128xf32> to vector<8x128xf32>
    %5 = arith.addf %2, %4 : vector<8x128xf32>
    %cst_5 = arith.constant 5.000000e-01 : f32
    %6 = vector.broadcast %cst_5 : f32 to vector<8x128xf32>
    %7 = arith.mulf %5, %6 : vector<8x128xf32>
    %cst_6 = arith.constant 0.707106769 : f32
    %8 = vector.broadcast %cst_6 : f32 to vector<8x128xf32>
    %9 = arith.mulf %5, %8 : vector<8x128xf32>
    %10 = math.erf %9 : vector<8x128xf32>
    %cst_7 = arith.constant 1.000000e+00 : f32
    %11 = vector.broadcast %cst_7 : f32 to vector<8x128xf32>
    %12 = arith.addf %11, %10 : vector<8x128xf32>
    %13 = arith.mulf %7, %12 : vector<8x128xf32>
    %cst_8 = arith.constant dense<0.000000e+00> : vector<8xf32>
    %14 = vector.multi_reduction <add>, %13, %cst_8 [1] : vector<8x128xf32> to vector<8xf32>
    %15 = vector.shape_cast %14 : vector<8xf32> to vector<8x1xf32>
    %cst_9 = arith.constant 3.125000e-02 : f32
    %16 = vector.broadcast %cst_9 : f32 to vector<8x1xf32>
    %17 = arith.mulf %15, %16 : vector<8x1xf32>
    %18 = arith.mulf %13, %13 : vector<8x128xf32>
    %cst_10 = arith.constant dense<0.000000e+00> : vector<8xf32>
    %19 = vector.multi_reduction <add>, %18, %cst_10 [1] : vector<8x128xf32> to vector<8xf32>
    %20 = vector.shape_cast %19 : vector<8xf32> to vector<8x1xf32>
    %cst_11 = arith.constant 3.125000e-02 : f32
    %21 = vector.broadcast %cst_11 : f32 to vector<8x1xf32>
    %22 = arith.mulf %20, %21 : vector<8x1xf32>
    %23 = arith.mulf %17, %17 : vector<8x1xf32>
    %24 = arith.subf %22, %23 : vector<8x1xf32>
    %cst_12 = arith.constant 0.000000e+00 : f32
    %25 = vector.broadcast %cst_12 : f32 to vector<8x1xf32>
    %26 = arith.maximumf %24, %25 : vector<8x1xf32>
    %27 = vector.broadcast %17 : vector<8x1xf32> to vector<8x128xf32>
    %28 = arith.subf %13, %27 : vector<8x128xf32>
    %cst_13 = arith.constant 9.99999996E-13 : f32
    %29 = vector.broadcast %cst_13 : f32 to vector<8x1xf32>
    %30 = arith.addf %26, %29 : vector<8x1xf32>
    %31 = math.rsqrt %30 : vector<8x1xf32>
    %32 = vector.broadcast %31 : vector<8x1xf32> to vector<8x128xf32>
    %33 = arith.mulf %28, %32 : vector<8x128xf32>
    %c0_14 = arith.constant 0 : index
    %c0_15 = arith.constant 0 : index
    %34 = vector.load %arg4[%c0_14, %c0_15] : memref<1x128xf32, #tpu.memory_space<vmem>>, vector<1x128xf32>
    %35 = vector.broadcast %34 : vector<1x128xf32> to vector<8x128xf32>
    %36 = arith.mulf %33, %35 : vector<8x128xf32>
    %c0_16 = arith.constant 0 : index
    %c0_17 = arith.constant 0 : index
    %37 = vector.load %arg5[%c0_16, %c0_17] : memref<1x128xf32, #tpu.memory_space<vmem>>, vector<1x128xf32>
    %38 = vector.broadcast %37 : vector<1x128xf32> to vector<8x128xf32>
    %39 = arith.addf %36, %38 : vector<8x128xf32>
    %40 = arith.truncf %39 : vector<8x128xf32> to vector<8x128xbf16>
    %c0_18 = arith.constant 0 : index
    %c0_19 = arith.constant 0 : index
    %41 = vector.load %arg6[%c0_18, %c0_19] : memref<128x128xbf16, #tpu.memory_space<vmem>>, vector<128x128xbf16>
    %cst_20 = arith.constant dense<0.000000e+00> : vector<8x128xf32>
    %42 = tpu.matmul %40, %41, %cst_20 {dimension_numbers = #tpu.dot_dimension_numbers<[1], [0], [0], [1], [0, 0, 1, 1], [], []>} : vector<8x128xbf16>, vector<128x128xbf16>, vector<8x128xf32> -> vector<8x128xf32>
    %c0_21 = arith.constant 0 : index
    %c0_22 = arith.constant 0 : index
    %43 = vector.load %arg7[%c0_21, %c0_22] : memref<1x128xf32, #tpu.memory_space<vmem>>, vector<1x128xf32>
    %44 = vector.broadcast %43 : vector<1x128xf32> to vector<8x128xf32>
    %45 = arith.addf %42, %44 : vector<8x128xf32>
    %c0_23 = arith.constant 0 : index
    %c0_24 = arith.constant 0 : index
    %46 = vector.load %arg8[%c0_23, %c0_24] : memref<8x128xf32, #tpu.memory_space<vmem>>, vector<8x128xf32>
    tpu.vector_store %arg8[%c0_23, %c0_24], %45 {strides = array<i32>} : memref<8x128xf32, #tpu.memory_space<vmem>>, vector<8x128xf32>,
    return
  }
  func.func @transform_0(%arg0: i32) -> (i32, i32) {
    %c0_i32 = arith.constant 0 : i32
    %c0_i32_0 = arith.constant 0 : i32
    return %arg0, %c0_i32 : i32, i32
  }
  func.func @transform_1(%arg0: i32) -> (i32, i32) {
    %c0_i32 = arith.constant 0 : i32
    %c0_i32_0 = arith.constant 0 : i32
    %c0_i32_1 = arith.constant 0 : i32
    return %c0_i32, %c0_i32_0 : i32, i32
  }
  func.func @transform_2(%arg0: i32) -> (i32, i32) {
    %c0_i32 = arith.constant 0 : i32
    %c0_i32_0 = arith.constant 0 : i32
    %c0_i32_1 = arith.constant 0 : i32
    return %c0_i32, %c0_i32_0 : i32, i32
  }
  func.func @transform_3(%arg0: i32) -> (i32, i32) {
    %c0_i32 = arith.constant 0 : i32
    %c0_i32_0 = arith.constant 0 : i32
    %c0_i32_1 = arith.constant 0 : i32
    return %c0_i32, %c0_i32_0 : i32, i32
  }
  func.func @transform_4(%arg0: i32) -> (i32, i32) {
    %c0_i32 = arith.constant 0 : i32
    %c0_i32_0 = arith.constant 0 : i32
    %c0_i32_1 = arith.constant 0 : i32
    return %c0_i32, %c0_i32_0 : i32, i32
  }
  func.func @transform_5(%arg0: i32) -> (i32, i32) {
    %c0_i32 = arith.constant 0 : i32
    %c0_i32_0 = arith.constant 0 : i32
    %c0_i32_1 = arith.constant 0 : i32
    return %c0_i32, %c0_i32_0 : i32, i32
  }
  func.func @transform_6(%arg0: i32) -> (i32, i32) {
    %c0_i32 = arith.constant 0 : i32
    %c0_i32_0 = arith.constant 0 : i32
    %c0_i32_1 = arith.constant 0 : i32
    return %c0_i32, %c0_i32_0 : i32, i32
  }
  func.func @transform_7(%arg0: i32) -> (i32, i32) {
    %c0_i32 = arith.constant 0 : i32
    %c0_i32_0 = arith.constant 0 : i32
    return %arg0, %c0_i32 : i32, i32
  }
}

module attributes {stable_mosaic.version = 11 : i64} {
  func.func @esm_lm_head_kernel(%arg0: i32, %arg1: memref<8x128xbf16, #tpu.memory_space<vmem>>, %arg2: memref<128x128xbf16, #tpu.memory_space<vmem>>, %arg3: memref<1x128xf32, #tpu.memory_space<vmem>>, %arg4: memref<1x128xf32, #tpu.memory_space<vmem>>, %arg5: memref<1x128xf32, #tpu.memory_space<vmem>>, %arg6: memref<128x128xbf16, #tpu.memory_space<vmem>>, %arg7: memref<1x128xf32, #tpu.memory_space<vmem>>, %arg8: memref<8x128xf32, #tpu.memory_space<vmem>>) attributes {dimension_semantics = [#tpu.dimension_semantics<parallel>], iteration_bounds = array<i64: 2>, scalar_prefetch = 0 : i64, scratch_operands = 0 : i64, tpu.core_type = #tpu.core_type<tc>, window_params = [{transform_indices = @transform_0, window_bounds = array<i64: 8, 128>}, {pipeline_mode = #tpu.pipeline_mode<synchronous>, transform_indices = @transform_1, window_bounds = array<i64: 128, 128>}, {pipeline_mode = #tpu.pipeline_mode<synchronous>, transform_indices = @transform_2, window_bounds = array<i64: 1, 128>}, {pipeline_mode = #tpu.pipeline_mode<synchronous>, transform_indices = @transform_3, window_bounds = array<i64: 1, 128>}, {pipeline_mode = #tpu.pipeline_mode<synchronous>, transform_indices = @transform_4, window_bounds = array<i64: 1, 128>}, {pipeline_mode = #tpu.pipeline_mode<synchronous>, transform_indices = @transform_5, window_bounds = array<i64: 128, 128>}, {pipeline_mode = #tpu.pipeline_mode<synchronous>, transform_indices = @transform_6, window_bounds = array<i64: 1, 128>}, {transform_indices = @transform_7, window_bounds = array<i64: 8, 128>}]} {
    %c0 = arith.constant 0 : index
    %c0_0 = arith.constant 0 : index
    %0 = vector.load %arg1[%c0, %c0_0] : memref<8x128xbf16, #tpu.memory_space<vmem>>, vector<8x128xbf16>
    %c0_1 = arith.constant 0 : index
    %c0_2 = arith.constant 0 : index
    %1 = vector.load %arg2[%c0_1, %c0_2] : memref<128x128xbf16, #tpu.memory_space<vmem>>, vector<128x128xbf16>
    %cst = arith.constant dense<0.000000e+00> : vector<8x128xf32>
    %2 = tpu.matmul %0, %1, %cst {dimension_numbers = #tpu.dot_dimension_numbers<[1], [0], [0], [1], [0, 0, 1, 1], [], []>} : vector<8x128xbf16>, vector<128x128xbf16>, vector<8x128xf32> -> vector<8x128xf32>
    %c0_3 = arith.constant 0 : index
    %c0_4 = arith.constant 0 : index
    %3 = vector.load %arg3[%c0_3, %c0_4] : memref<1x128xf32, #tpu.memory_space<vmem>>, vector<1x128xf32>
    %4 = vector.broadcast %3 : vector<1x128xf32> to vector<8x128xf32>
    %5 = arith.addf %2, %4 : vector<8x128xf32>
    %cst_5 = arith.constant 5.000000e-01 : f32
    %6 = vector.broadcast %cst_5 : f32 to vector<8x128xf32>
    %7 = arith.mulf %5, %6 : vector<8x128xf32>
    %cst_6 = arith.constant 0.707106769 : f32
    %8 = vector.broadcast %cst_6 : f32 to vector<8x128xf32>
    %9 = arith.mulf %5, %8 : vector<8x128xf32>
    %10 = math.erf %9 : vector<8x128xf32>
    %cst_7 = arith.constant 1.000000e+00 : f32
    %11 = vector.broadcast %cst_7 : f32 to vector<8x128xf32>
    %12 = arith.addf %11, %10 : vector<8x128xf32>
    %13 = arith.mulf %7, %12 : vector<8x128xf32>
    %cst_8 = arith.constant dense<0.000000e+00> : vector<8xf32>
    %14 = vector.multi_reduction <add>, %13, %cst_8 [1] : vector<8x128xf32> to vector<8xf32>
    %15 = vector.shape_cast %14 : vector<8xf32> to vector<8x1xf32>
    %cst_9 = arith.constant 3.125000e-02 : f32
    %16 = vector.broadcast %cst_9 : f32 to vector<8x1xf32>
    %17 = arith.mulf %15, %16 : vector<8x1xf32>
    %18 = arith.mulf %13, %13 : vector<8x128xf32>
    %cst_10 = arith.constant dense<0.000000e+00> : vector<8xf32>
    %19 = vector.multi_reduction <add>, %18, %cst_10 [1] : vector<8x128xf32> to vector<8xf32>
    %20 = vector.shape_cast %19 : vector<8xf32> to vector<8x1xf32>
    %cst_11 = arith.constant 3.125000e-02 : f32
    %21 = vector.broadcast %cst_11 : f32 to vector<8x1xf32>
    %22 = arith.mulf %20, %21 : vector<8x1xf32>
    %23 = arith.mulf %17, %17 : vector<8x1xf32>
    %24 = arith.subf %22, %23 : vector<8x1xf32>
    %cst_12 = arith.constant 0.000000e+00 : f32
    %25 = vector.broadcast %cst_12 : f32 to vector<8x1xf32>
    %26 = arith.maximumf %24, %25 : vector<8x1xf32>
    %27 = vector.broadcast %17 : vector<8x1xf32> to vector<8x128xf32>
    %28 = arith.subf %13, %27 : vector<8x128xf32>
    %cst_13 = arith.constant 9.99999996E-13 : f32
    %29 = vector.broadcast %cst_13 : f32 to vector<8x1xf32>
    %30 = arith.addf %26, %29 : vector<8x1xf32>
    %31 = math.rsqrt %30 : vector<8x1xf32>
    %32 = vector.broadcast %31 : vector<8x1xf32> to vector<8x128xf32>
    %33 = arith.mulf %28, %32 : vector<8x128xf32>
    %c0_14 = arith.constant 0 : index
    %c0_15 = arith.constant 0 : index
    %34 = vector.load %arg4[%c0_14, %c0_15] : memref<1x128xf32, #tpu.memory_space<vmem>>, vector<1x128xf32>
    %35 = vector.broadcast %34 : vector<1x128xf32> to vector<8x128xf32>
    %36 = arith.mulf %33, %35 : vector<8x128xf32>
    %c0_16 = arith.constant 0 : index
    %c0_17 = arith.constant 0 : index
    %37 = vector.load %arg5[%c0_16, %c0_17] : memref<1x128xf32, #tpu.memory_space<vmem>>, vector<1x128xf32>
    %38 = vector.broadcast %37 : vector<1x128xf32> to vector<8x128xf32>
    %39 = arith.addf %36, %38 : vector<8x128xf32>
    %40 = arith.truncf %39 : vector<8x128xf32> to vector<8x128xbf16>
    %c0_18 = arith.constant 0 : index
    %c0_19 = arith.constant 0 : index
    %41 = vector.load %arg6[%c0_18, %c0_19] : memref<128x128xbf16, #tpu.memory_space<vmem>>, vector<128x128xbf16>
    %cst_20 = arith.constant dense<0.000000e+00> : vector<8x128xf32>
    %42 = tpu.matmul %40, %41, %cst_20 {dimension_numbers = #tpu.dot_dimension_numbers<[1], [0], [0], [1], [0, 0, 1, 1], [], []>} : vector<8x128xbf16>, vector<128x128xbf16>, vector<8x128xf32> -> vector<8x128xf32>
    %c0_21 = arith.constant 0 : index
    %c0_22 = arith.constant 0 : index
    %43 = vector.load %arg7[%c0_21, %c0_22] : memref<1x128xf32, #tpu.memory_space<vmem>>, vector<1x128xf32>
    %44 = vector.broadcast %43 : vector<1x128xf32> to vector<8x128xf32>
    %45 = arith.addf %42, %44 : vector<8x128xf32>
    %c0_23 = arith.constant 0 : index
    %c0_24 = arith.constant 0 : index
    %46 = vector.load %arg8[%c0_23, %c0_24] : memref<8x128xf32, #tpu.memory_space<vmem>>, vector<8x128xf32>
    tpu.vector_store %arg8[%c0_23, %c0_24], %45 {strides = array<i32>} : memref<8x128xf32, #tpu.memory_space<vmem>>, vector<8x128xf32>,
    return
  }
  func.func @transform_0(%arg0: i32) -> (i32, i32) {
    %c0_i32 = arith.constant 0 : i32
    %c0_i32_0 = arith.constant 0 : i32
    return %arg0, %c0_i32 : i32, i32
  }
  func.func @transform_1(%arg0: i32) -> (i32, i32) {
    %c0_i32 = arith.constant 0 : i32
    %c0_i32_0 = arith.constant 0 : i32
    %c0_i32_1 = arith.constant 0 : i32
    return %c0_i32, %c0_i32_0 : i32, i32
  }
  func.func @transform_2(%arg0: i32) -> (i32, i32) {
    %c0_i32 = arith.constant 0 : i32
    %c0_i32_0 = arith.constant 0 : i32
    %c0_i32_1 = arith.constant 0 : i32
    return %c0_i32, %c0_i32_0 : i32, i32
  }
  func.func @transform_3(%arg0: i32) -> (i32, i32) {
    %c0_i32 = arith.constant 0 : i32
    %c0_i32_0 = arith.constant 0 : i32
    %c0_i32_1 = arith.constant 0 : i32
    return %c0_i32, %c0_i32_0 : i32, i32
  }
  func.func @transform_4(%arg0: i32) -> (i32, i32) {
    %c0_i32 = arith.constant 0 : i32
    %c0_i32_0 = arith.constant 0 : i32
    %c0_i32_1 = arith.constant 0 : i32
    return %c0_i32, %c0_i32_0 : i32, i32
  }
  func.func @transform_5(%arg0: i32) -> (i32, i32) {
    %c0_i32 = arith.constant 0 : i32
    %c0_i32_0 = arith.constant 0 : i32
    %c0_i32_1 = arith.constant 0 : i32
    return %c0_i32, %c0_i32_0 : i32, i32
  }
  func.func @transform_6(%arg0: i32) -> (i32, i32) {
    %c0_i32 = arith.constant 0 : i32
    %c0_i32_0 = arith.constant 0 : i32
    %c0_i32_1 = arith.constant 0 : i32
    return %c0_i32, %c0_i32_0 : i32, i32
  }
  func.func @transform_7(%arg0: i32) -> (i32, i32) {
    %c0_i32 = arith.constant 0 : i32
    %c0_i32_0 = arith.constant 0 : i32
    return %arg0, %c0_i32 : i32, i32
  }
}

</mosaic_0001>

<bundles_post_ra>
// kernel: tpu_custom_call.1
= control target key start
LH: loop header
LB: loop body
LE: loop exit
PB: predicated region body
PF: predicated region fallthrough
CT: control target
= control target key end

     0   :  { %s1281_s0 = inlined_call_operand.hbm [shape: bf16[16,128], index: 0, kind: input, shape index: {}]   ;;  %s1282_s1 = inlined_call_operand.hbm [shape: bf16[128,128], index: 1, kind: input, shape index: {}]   ;;  %s1283_s2 = inlined_call_operand.vmem [shape: f32[1,128], index: 2, kind: input, shape index: {}]   ;;  %s1284_s3 = inlined_call_operand.vmem [shape: f32[1,128], index: 3, kind: input, shape index: {}]   ;;  %s1285_s4 = inlined_call_operand.vmem [shape: f32[1,128], index: 4, kind: input, shape index: {}]   ;;  %s1286_s5 = inlined_call_operand.hbm [shape: bf16[128,128], index: 5, kind: input, shape index: {}]   ;;  %s1287_s6 = inlined_call_operand.vmem [shape: f32[1,128], index: 6, kind: input, shape index: {}]   ;;  %s1288_s7 = inlined_call_operand.hbm [shape: f32[16,128], index: 7, kind: output, shape index: {}]  }
   0x1   :  { %1293 = sst [smem:[#allocation12_spill]] %s1282_s1 }
   0x2   :  { %1294 = sst [smem:[#allocation13_spill]] %s1286_s5 }
   0x3   :  { %12 = vsyncpa [#allocation3], 0 }
   0x4   :  { %14 = vsyncpa [#allocation3 + $0x1], 0 }
   0x5   :  { %15 = vsyncpa [#allocation6], 0 }
   0x6   :  { %16 = vsyncpa [#allocation4], 0 }
   0x7   :  { %18 = vsyncpa [#allocation4 + $0x1], 0  ;;  %s1070_s24 = smov 0   ;;  %s1072_s25 = smov 0  }
   0x8   :  { %s1074_s26 = smov 0   ;;  %s1076_s27 = smov 0  }
   0x9 LB: > { %s1091_s28 = sadd.s32 4294967295, %s1020_s27   ;;  %s687_s29 = sadd.s32 4294967294, %s1020_s27   ;;  %s1020_s27 = sphi %s1076_s27, %s1314_s27   ;;  %s1016_s26 = sphi %s1074_s26, %s1313_s26   ;;  %s1012_s25 = sphi %s1072_s25, %s1312_s25   ;;  %s1008_s24 = sphi %s1070_s24, %s1311_s24  }
   0xa   : > { %p44_p0 = scmp.ne.s32.totalorder %s1012_s25, %s1008_s24  ;;  %p1289_p1 = scmp.eq.s32.totalorder %s1091_s28, 0 }
   0xb   : > { %p200_p3 = scmp.eq.s32.totalorder %s687_s29, 1  ;;  %p688_p5 = scmp.ge.s32.totalorder %s1020_s27, 1 }
   0xc   : > { %p1100_p4 = por %p1289_p1, %p44_p0  ;;  %p207_p7 = scmp.lt.s32.totalorder %s1020_s27, 3 }
   0xd   : > { %p1105_p6 = por %p200_p3, %p44_p0  ;;  %s1022_s10 = smov [#allocation5]  }
   0xe   : > { %s1295_s30 = scalar_select %p1100_p4, 1, 0 }
   0xf   : > { %s1296_s8 = scalar_select %p1105_p6, 1, 0 }
  0x10   : > { %p1110_p8 = pnand %p688_p5, %p207_p7  ;;  %s219_s11 = sshll.u32 %s1022_s10, 4  ;;  %s220_s11 = int_to_ptr.vmem [resolvable:$true] %s219_s11 }
  0x11   : > { %s1023_s13 = smov [#allocation7]   ;;  %s883_s15 = scalar_lea.vmem %s220_s11, 1024 }
  0x12   : > { %s1297_s9 = scalar_select %p1110_p8, 1, 0 }
  0x13   : > { %p793_p9 = pneg %p1110_p8  ;;  %s241_s14 = sshll.u32 %s1023_s13, 4  ;;  %s242_s14 = int_to_ptr.vmem [resolvable:$true] %s241_s14 }
  0x14   : > { %p884_p13 = scmp.ne.s32.totalorder %s220_s11, %s883_s15  ;;  %p891_p5 = scmp.lt.s32.totalorder %s220_s11, %s220_s11 }
  0x15   : > { %p1119_p11 = pnand %p793_p9, %p1289_p1  ;;  %p892_p7 = scmp.lt.s32.totalorder %s883_s15, %s883_s15 }
  0x17   : > { %p874_p12 = pneg %p1119_p11  ;;  %p893_p10 = por %p892_p7, %p891_p5 }
  0x19   : > { %p886_p0 = pnand %p884_p13, %p874_p12 }
  0x1b   : > { %p887_p3 = pneg %p886_p0 }
  0x1d   : > { %p894_p9 = pnand %p893_p10, %p887_p3 }
  0x1f   : > { %897 = shalt.err (!%p894_p9)
}
  0x20   : > { %s1024_s16 = smov 64   ;;  %s1025_s17 = smov 4  }
  0x21   : > { %s1299_s1 = sld [smem:[#allocation12_spill]]  ;;  %s909_s20 = scalar_lea.vmem %s242_s14, 1024 }
  0x22   : > { %p910_p1 = scmp.ne.s32.totalorder %s242_s14, %s909_s20  ;;  %p917_p2 = scmp.lt.s32.totalorder %s242_s14, %s242_s14 }
  0x23   : > { %p918_p6 = scmp.lt.s32.totalorder %s909_s20, %s909_s20 }
  0x24   : > { %p912_p13 = pnand %p910_p1, %p874_p12 }
  0x25   : > { %p919_p5 = por %p918_p6, %p917_p2 }
  0x26   : > { %p913_p0 = pneg %p912_p13 }
  0x27   : > { %796 = dma.hbm_to_vmem [thread:$0]  (!%p1119_p11), %s1299_s1, 1024, %s220_s11, [#allocation6], %s1024_s16, %s1024_s16, %s1025_s17  }
  0x28   : > { %p920_p10 = pnand %p919_p5, %p913_p0 }
  0x2a   : > { %923 = shalt.err (!%p920_p10)
}
  0x2b   : > { %s1300_s5 = sld [smem:[#allocation13_spill]]  ;;  %s1142_s23 = sadd.s32 1, %s1020_s27  }
  0x2c   : > { %s31_s29 = sadd.s32 1, %s1016_s26  ;;  %s28_s10 = ssub.s32 %s1020_s27, %s1142_s23 }
  0x2d   : > { %p38_p1 = scmp.ne.s32.totalorder %s1016_s26, %s1012_s25  ;;  %p29_p2 = scmp.eq.s32.totalorder %s28_s10, 0 }
  0x2e   : > { %p39_p6 = scmp.eq.s32.totalorder %s1020_s27, 0  ;;  %p1301_p12 = scmp.eq.s32.totalorder %s1091_s28, 1 }
  0x2f   : > { %p810_p7 = scmp.lt.s32.totalorder %s1020_s27, 2  ;;  %s258_s13 = sand.u32 1, %s1016_s26  }
  0x30   : > { %p1152_p3 = por %p1301_p12, %p38_p1  ;;  %p40_p9 = por %p39_p6, %p38_p1 }
  0x31   : > { %799 = dma.hbm_to_vmem [thread:$0]  (!%p1119_p11), %s1300_s5, 1024, %s242_s14, [#allocation6], %s1024_s16, %s1024_s16, %s1025_s17  }
  0x32   : > { %s1302_s11 = scalar_select %p1152_p3, 1, 0 }
  0x33   : > { %s1158_s12 = scalar_select %p29_p2, %s1016_s26, %s31_s29  }
  0x34   : > { %s692_s15 = sshll.u32 %s258_s13, 2  ;;  %s693_s14 = sshll.u32 %s1020_s27, 6 }
  0x35   : > { %s1165_s18 = scalar_lea.hbm %s1281_s0, %s693_s14  ;;  %s262_s19 = scalar_lea.vmem [#allocation2], %s692_s15 }
  0x36   : > { %s269_s20 = sshll.u32 %s262_s19, 4  ;;  %p1167_p11 = pnand %p810_p7, %p40_p9  ;;  %s270_s20 = int_to_ptr.vmem [resolvable:$true] %s269_s20 }
  0x37   : > { %s259_s22 = scalar_lea.sflag [#allocation3], %s258_s13  ;;  %s924_s29 = scalar_lea.hbm %s1165_s18, 64 }
  0x38   : > { %p925_p13 = scmp.ne.s32.totalorder %s1165_s18, %s924_s29  ;;  %p926_p0 = pneg %p1167_p11 }
  0x39   : > { %s929_s16 = scalar_lea.hbm %s1281_s0, 128  ;;  %p930_p1 = scmp.lt.s32.totalorder %s1165_s18, %s1281_s0 }
  0x3a   : > { %p927_p5 = pnand %p926_p0, %p925_p13  ;;  %p931_p2 = scmp.lt.s32.totalorder %s929_s16, %s924_s29 }
  0x3c   : > { %p928_p10 = pneg %p927_p5  ;;  %p932_p6 = por %p931_p2, %p930_p1 }
  0x3e   : > { %p933_p12 = pnand %p932_p6, %p928_p10 }
  0x40   : > { %936 = shalt.err (!%p933_p12)
}
  0x41   : > { %s937_s19 = scalar_lea.vmem %s270_s20, 64  ;;  %s1026_s13 = smov [#allocation2]  }
  0x42   : > { %p938_p7 = scmp.ne.s32.totalorder %s270_s20, %s937_s19  ;;  %s942_s1 = sshll.u32 %s1026_s13, 4  ;;  %s943_s1 = int_to_ptr.vmem [resolvable:$false] %s942_s1 }
  0x43   : > { %s944_s5 = scalar_lea.vmem %s943_s1, 128  ;;  %p945_p13 = scmp.lt.s32.totalorder %s270_s20, %s943_s1 }
  0x44   : > { %p940_p9 = pnand %p938_p7, %p926_p0  ;;  %p946_p5 = scmp.lt.s32.totalorder %s944_s5, %s937_s19 }
  0x46   : > { %p941_p3 = pneg %p940_p9  ;;  %p947_p4 = por %p946_p5, %p945_p13 }
  0x48   : > { %p948_p8 = pnand %p947_p4, %p941_p3 }
  0x4a   : > { %951 = shalt.err (!%p948_p8)
}
  0x4b   : > { %803 = dma.hbm_to_vmem [thread:$0]  (!%p1167_p11), %s1165_s18, 64, %s270_s20, %s259_s22  }
  0x4c   : > { %p1304_p10 = scmp.ne.s32.totalorder %s1297_s9, 0 }
  0x4d   : > { %s1188_s29 = sand.u32 (!%p1304_p10), 1, %s1012_s25   ;;  %p1305_p0 = scmp.ne.s32.totalorder (!%p1304_p10), %s1295_s30, 0 }
  0x4e   : > { %278 = sbr.rel (%p1304_p10) target bundleno = 717 (0x2cd), region = 48  ;;  %s695_s10 = sshll.u32 (!%p1304_p10), %s1188_s29, 2 }
  0x4f   : > { %s281_s14 = scalar_lea.sflag (!%p1304_p10), [#allocation3], %s1188_s29  ;;  %s1192_s1 = scalar_lea.vmem (!%p1304_p10), [#allocation2], %s695_s10 }
  0x53   : > { %995 = dma.done.wait (%p1305_p0), %s281_s14, 64  }
  0x54   : > { %997 = vsyncadd (%p1305_p0), %s281_s14, 4294967232  ;;  %p1306_p4 = scmp.eq.s32.totalorder %s1091_s28, 0 }
  0x56   : > { %999 = dma.done.wait (%p1306_p4), [#allocation6], 2048   ;;  %p1307_p8 = pmov %p1306_p4 }
  0x57   : > { %v1027_v0 = vmov 0.0   ;;  %vm1028_vm0 = vmmov 0   ;;  %v852_v1 = vld [vmem:[#allocation5 + $0x38] sm:$0xff]   ;;  %v853_v2 = vld [vmem:[#allocation5 + $0x30] sm:$0xff]   ;;  %v854_v3 = vld [vmem:[#allocation5 + $0x28] sm:$0xff]   ;;  %s698_s22 = sshll.u32 %s1188_s29, 3 }
  0x58   : > { %1001 = vsyncadd (%p1307_p8), [#allocation6], 4294965248  ;;  %741 = vmatprep.subr.bf16.mxu0 %v1027_v0  ;;  %757 = vmatprep.mubr.msk.bf16.mxu0 %vm1028_vm0, %v1027_v0  ;;  %v855_v4 = vld [vmem:[#allocation5 + $0x20] sm:$0xff]   ;;  %v856_v5 = vld [vmem:[#allocation5 + $0x18] sm:$0xff]   ;;  %s720_s15 = sshll.u32 %s1091_s28, 7  ;;  %s322_s19 = scalar_lea.vmem [#allocation8], %s698_s22 }
  0x59   : > { %761 = vmatprep.subr.bf16.mxu1 %v1027_v0  ;;  %777 = vmatprep.mubr.msk.bf16.mxu1 %vm1028_vm0, %v1027_v0  ;;  %v857_v6 = vld [vmem:[#allocation5 + $0x10] sm:$0xff]   ;;  %v858_v7 = vld [vmem:[#allocation5 + $0x8] sm:$0xff]   ;;  %v859_v8 = vld [vmem:[#allocation5] sm:$0xff]   ;;  %s598_s13 = sshll.u32 %s322_s19, 4  ;;  %s585_s5 = scalar_lea.sflag [#allocation4], %s1188_s29  ;;  %s1240_s13 = int_to_ptr.vmem [resolvable:$true] %s598_s13 }
  0x5a   : > { %742 = vmatpush3.bf16.msra.mxu0 %v852_v1  ;;  %v324_v9 = vld [vmem:[%s1192_s1] sm:$0xf]  ;;  %v861_v23 = vld [vmem:[#allocation7 + $0x30] sm:$0xff]   ;;  %v862_v24 = vld [vmem:[#allocation7 + $0x28] sm:$0xff]   ;;  %s1238_s1 = scalar_lea.hbm %s1288_s7, %s720_s15  ;;  %s952_s30 = scalar_lea.vmem %s1240_s13, 128 }
  0x5b   : > { %743 = vmatprep.subr.bf16.mxu0 %v1027_v0  ;;  %v699_v10 = vld [vmem:[%s1283_s2] ss:$0 sm:$0xff]  ;;  %v863_v25 = vld [vmem:[#allocation7 + $0x20] sm:$0xff]   ;;  %v865_v27 = vld [vmem:[#allocation7 + $0x10] sm:$0xff]   ;;  %p953_p3 = scmp.ne.s32.totalorder %s1240_s13, %s952_s30  ;;  %p1308_p11 = scmp.ne.s32.totalorder %s1302_s11, 0 }
  0x5c   : > { %v860_v22 = vld [vmem:[#allocation7 + $0x38] sm:$0xff]   ;;  %v866_v28 = vld [vmem:[#allocation7 + $0x8] sm:$0xff]   ;;  %v867_v29 = vld [vmem:[#allocation7] sm:$0xff]   ;;  %s1029_s28 = smov [#allocation8]  }
  0x5d   : > { %762 = vmatpush3.bf16.msra.mxu1 %v860_v22  ;;  %v864_v26 = vld [vmem:[#allocation7 + $0x18] sm:$0xff]   ;;  %p954_p1 = pnand %p953_p3, %p1308_p11  ;;  %s956_s9 = sshll.u32 %s1029_s28, 4  ;;  %s957_s9 = int_to_ptr.vmem [resolvable:$false] %s956_s9 }
  0x5e   : > { %744 = vmatpush3.bf16.msra.mxu0 %v853_v2  ;;  %763 = vmatprep.subr.bf16.mxu1 %v1027_v0  ;;  %v708_v40 = vld [vmem:[%s1284_s3] ss:$0 sm:$0xff]  ;;  %s958_s18 = scalar_lea.vmem %s957_s9, 256  ;;  %p959_p6 = scmp.lt.s32.totalorder %s1240_s13, %s957_s9 }
  0x5f   : > { %745 = vmatprep.subr.bf16.mxu0 %v1027_v0  ;;  %v709_v42 = vld [vmem:[%s1285_s4] ss:$0 sm:$0xff]  ;;  %p955_p2 = pneg %p954_p1  ;;  %p960_p12 = scmp.lt.s32.totalorder %s958_s18, %s952_s30 }
  0x60   : > { %v710_v46 = vld [vmem:[%s1287_s6] ss:$0 sm:$0xff] }
  0x61   : > { %764 = vmatpush3.bf16.msra.mxu1 %v861_v23  ;;  %p961_p7 = por %p960_p12, %p959_p6 }
  0x62   : > { %746 = vmatpush3.bf16.msra.mxu0 %v854_v3  ;;  %765 = vmatprep.subr.bf16.mxu1 %v1027_v0 }
  0x63   : > { %747 = vmatprep.subr.bf16.mxu0 %v1027_v0  ;;  %p962_p9 = pnand %p961_p7, %p955_p2 }
  0x65   : > { %766 = vmatpush3.bf16.msra.mxu1 %v862_v24 }
  0x66   : > { %748 = vmatpush3.bf16.msra.mxu0 %v855_v4  ;;  %767 = vmatprep.subr.bf16.mxu1 %v1027_v0 }
  0x67   : > { %749 = vmatprep.subr.bf16.mxu0 %v1027_v0 }
  0x69   : > { %768 = vmatpush3.bf16.msra.mxu1 %v863_v25 }
  0x6a   : > { %750 = vmatpush3.bf16.msra.mxu0 %v856_v5  ;;  %769 = vmatprep.subr.bf16.mxu1 %v1027_v0 }
  0x6b   : > { %751 = vmatprep.subr.bf16.mxu0 %v1027_v0 }
  0x6d   : > { %770 = vmatpush3.bf16.msra.mxu1 %v864_v26 }
  0x6e   : > { %752 = vmatpush3.bf16.msra.mxu0 %v857_v6  ;;  %771 = vmatprep.subr.bf16.mxu1 %v1027_v0 }
  0x6f   : > { %753 = vmatprep.subr.bf16.mxu0 %v1027_v0 }
  0x71   : > { %772 = vmatpush3.bf16.msra.mxu1 %v865_v27 }
  0x72   : > { %754 = vmatpush3.bf16.msra.mxu0 %v858_v7  ;;  %773 = vmatprep.subr.bf16.mxu1 %v1027_v0 }
  0x73   : > { %755 = vmatprep.subr.bf16.mxu0 %v1027_v0 }
  0x75   : > { %774 = vmatpush3.bf16.msra.mxu1 %v866_v28 }
  0x76   : > { %756 = vmatpush3.bf16.msra.mxu0 %v859_v8  ;;  %775 = vmatprep.subr.bf16.mxu1 %v1027_v0 }
  0x79   : > { %758 = vmatmul.mubr.bf16.vlgmr.msra.gmra.mxu0 %v324_v9  ;;  %776 = vmatpush3.bf16.msra.mxu1 %v867_v29 }
 0x139   : > { %v430_v11 = vpop.f32.mrf.mxu0 }
 0x13a   : > { %v431_v12 = vadd.f32 %v699_v10, %v430_v11 }
 0x13b   : > { %v759_v13 = vpop.f32.mrf.mxu0 }
 0x13c   : > { %v437_v14 = vmul.f32 0.70710677, %v431_v12  ;;  %v436_v18 = vmul.f32 0.5, %v431_v12 }
 0x13d   : > { %v433_v15 = vpop.f32.mrf.mxu0 }
 0x13e   : > { %868 = verf.f32 %v437_v14 }
 0x13f   : > { %v760_v16 = vpop.f32.mrf.mxu0 }
 0x14b   : > { %v869_v17 = vpop.eup %868 }
 0x14c   : > { %v439_v19 = vadd.f32 1.0, %v869_v17 }
 0x14e   : > { %v440_v20 = vmul.f32 %v439_v19, %v436_v18 }
 0x150   : > { %441 = vadd.xlane.f32.xlu0 %v440_v20  ;;  %v444_v21 = vmul.f32 %v440_v20, %v440_v20 }
 0x154   : > { %445 = vadd.xlane.f32.xlu0 %v444_v21 }
 0x1d9   : > { %v442_v30 = vpop.xlane.xlu0 %441 }
 0x1da   : > { %v443_v31 = vmul.f32 0.03125, %v442_v30 }
 0x1dc   : > { %v448_v33 = vmul.f32 %v443_v31, %v443_v31  ;;  %v451_v38 = vsub.f32 %v440_v20, %v443_v31 }
 0x1dd   : > { %v446_v32 = vpop.xlane.xlu0 %445 }
 0x1de   : > { %v447_v34 = vmul.f32 0.03125, %v446_v32 }
 0x1e0   : > { %v449_v35 = vsub.f32 %v447_v34, %v448_v33 }
 0x1e2   : > { %v450_v36 = vmax.f32 %v449_v35, 0.0 }
 0x1e4   : > { %v452_v37 = vadd.f32 1e-12, %v450_v36 }
 0x1e6   : > { %870 = vrsqrt.f32 %v452_v37 }
 0x1f3   : > { %v871_v39 = vpop.eup %870 }
 0x1f4   : > { %v454_v41 = vmul.f32 %v871_v39, %v451_v38 }
 0x1f6   : > { %v462_v43 = vmul.f32 %v708_v40, %v454_v41 }
 0x1f8   : > { %v470_v44 = vadd.f32 %v709_v42, %v462_v43 }
 0x1fa   : > { %v471_v45 = vpack.c.bf16 %v470_v44, %v470_v44 }
 0x1fc   : > { %778 = vmatmul.mubr.bf16.vlgmr.msra.gmra.mxu1 %v471_v45 }
 0x2bc   : > { %v577_v47 = vpop.f32.mrf.mxu1 }
 0x2bd   : > { %v578_v48 = vadd.f32 %v710_v46, %v577_v47 }
 0x2be   : > { %v779_v49 = vpop.f32.mrf.mxu1 }
 0x2bf   : > { %583 = vst [vmem:[%s322_s19] sm:$0xff] %v578_v48 }
 0x2c0   : > { %v580_v50 = vpop.f32.mrf.mxu1 }
 0x2c1   : > { %965 = shalt.err (!%p962_p9)
}
 0x2c2   : > { %s966_s20 = scalar_lea.hbm %s1238_s1, 128  ;;  %s970_s22 = scalar_lea.hbm %s1288_s7, 256 }
 0x2c3   : > { %p967_p13 = scmp.ne.s32.totalorder %s1238_s1, %s966_s20  ;;  %p971_p0 = scmp.lt.s32.totalorder %s1238_s1, %s1288_s7 }
 0x2c4   : > { %p972_p4 = scmp.lt.s32.totalorder %s970_s22, %s966_s20 }
 0x2c5   : > { %p968_p5 = pnand %p967_p13, %p1308_p11 }
 0x2c6   : > { %p973_p8 = por %p972_p4, %p971_p0 }
 0x2c7   : > { %p969_p10 = pneg %p968_p5 }
 0x2c9   : > { %p974_p3 = pnand %p973_p8, %p969_p10 }
 0x2cb   : > { %977 = shalt.err (!%p974_p3)
}
 0x2cc   : > { %791 = dma.vmem_to_hbm [thread:$0]  (%p1308_p11), %s1240_s13, 128, %s1238_s1, %s585_s5   ;;  %v780_v51 = vpop.f32.mrf.mxu1 }
 0x2cd PF: > { %s610_s15 = sand.u32 1, %s1008_s24   ;;  %p1309_p1 = scmp.ne.s32.totalorder %s1296_s8, 0 }
 0x2ce   : > { %p1310_p2 = scmp.ge.s32.totalorder %s1020_s27, 2  ;;  %s611_s19 = scalar_lea.sflag [#allocation4], %s610_s15 }
 0x2d0   : > { %p805_p6 = pnand %p1310_p2, %p1309_p1 }
 0x2d2   : > { %p806_p12 = pneg %p805_p6 }
 0x2d4   : > { %1003 = dma.done.wait (%p806_p12), %s611_s19, 128  }
 0x2d5   : > { %1005 = vsyncadd (%p806_p12), %s611_s19, 4294967168  ;;  %p21_p7 = scmp.ge.s32.totalorder %s1142_s23, 4   ;;  %s1311_s24 = smov %s1012_s25 }
 0x2d6   : > { %s1312_s25 = smov %s1016_s26  ;;  %s1313_s26 = smov %s1158_s12 }
 0x2d7   : > { %s1314_s27 = smov %s1142_s23  ;;  %23 = sbr.rel (!%p21_p7) target bundleno = 9 (0x9), region = 101 }
 0x2dc   :  { %616 = vsyncpa [#allocation3], 1 }
 0x2dd   :  { %618 = vsyncpa [#allocation3 + $0x1], 1 }
 0x2de   :  { %619 = vsyncpa [#allocation6], 1 }
 0x2df   :  { %620 = vsyncpa [#allocation4], 1 }
 0x2e0   :  { %622 = vsyncpa [#allocation4 + $0x1], 1 }

// kernel: tpu_custom_call.1
= control target key start
LH: loop header
LB: loop body
LE: loop exit
PB: predicated region body
PF: predicated region fallthrough
CT: control target
= control target key end

     0   :  { %s1281_s0 = inlined_call_operand.hbm [shape: bf16[16,128], index: 0, kind: input, shape index: {}]   ;;  %s1282_s1 = inlined_call_operand.hbm [shape: bf16[128,128], index: 1, kind: input, shape index: {}]   ;;  %s1283_s2 = inlined_call_operand.vmem [shape: f32[1,128], index: 2, kind: input, shape index: {}]   ;;  %s1284_s3 = inlined_call_operand.vmem [shape: f32[1,128], index: 3, kind: input, shape index: {}]   ;;  %s1285_s4 = inlined_call_operand.vmem [shape: f32[1,128], index: 4, kind: input, shape index: {}]   ;;  %s1286_s5 = inlined_call_operand.hbm [shape: bf16[128,128], index: 5, kind: input, shape index: {}]   ;;  %s1287_s6 = inlined_call_operand.vmem [shape: f32[1,128], index: 6, kind: input, shape index: {}]   ;;  %s1288_s7 = inlined_call_operand.hbm [shape: f32[16,128], index: 7, kind: output, shape index: {}]  }
   0x1   :  { %1293 = sst [smem:[#allocation12_spill]] %s1282_s1 }
   0x2   :  { %1294 = sst [smem:[#allocation13_spill]] %s1286_s5 }
   0x3   :  { %12 = vsyncpa [#allocation3], 0 }
   0x4   :  { %14 = vsyncpa [#allocation3 + $0x1], 0 }
   0x5   :  { %15 = vsyncpa [#allocation6], 0 }
   0x6   :  { %16 = vsyncpa [#allocation4], 0 }
   0x7   :  { %18 = vsyncpa [#allocation4 + $0x1], 0  ;;  %s1070_s24 = smov 0   ;;  %s1072_s25 = smov 0  }
   0x8   :  { %s1074_s26 = smov 0   ;;  %s1076_s27 = smov 0  }
   0x9 LB: > { %s1091_s28 = sadd.s32 4294967295, %s1020_s27   ;;  %s687_s29 = sadd.s32 4294967294, %s1020_s27   ;;  %s1020_s27 = sphi %s1076_s27, %s1314_s27   ;;  %s1016_s26 = sphi %s1074_s26, %s1313_s26   ;;  %s1012_s25 = sphi %s1072_s25, %s1312_s25   ;;  %s1008_s24 = sphi %s1070_s24, %s1311_s24  }
   0xa   : > { %p44_p0 = scmp.ne.s32.totalorder %s1012_s25, %s1008_s24  ;;  %p1289_p1 = scmp.eq.s32.totalorder %s1091_s28, 0 }
   0xb   : > { %p200_p3 = scmp.eq.s32.totalorder %s687_s29, 1  ;;  %p688_p5 = scmp.ge.s32.totalorder %s1020_s27, 1 }
   0xc   : > { %p1100_p4 = por %p1289_p1, %p44_p0  ;;  %p207_p7 = scmp.lt.s32.totalorder %s1020_s27, 3 }
   0xd   : > { %p1105_p6 = por %p200_p3, %p44_p0  ;;  %s1022_s10 = smov [#allocation5]  }
   0xe   : > { %s1295_s30 = scalar_select %p1100_p4, 1, 0 }
   0xf   : > { %s1296_s8 = scalar_select %p1105_p6, 1, 0 }
  0x10   : > { %p1110_p8 = pnand %p688_p5, %p207_p7  ;;  %s219_s11 = sshll.u32 %s1022_s10, 4  ;;  %s220_s11 = int_to_ptr.vmem [resolvable:$true] %s219_s11 }
  0x11   : > { %s1023_s13 = smov [#allocation7]   ;;  %s883_s15 = scalar_lea.vmem %s220_s11, 1024 }
  0x12   : > { %s1297_s9 = scalar_select %p1110_p8, 1, 0 }
  0x13   : > { %p793_p9 = pneg %p1110_p8  ;;  %s241_s14 = sshll.u32 %s1023_s13, 4  ;;  %s242_s14 = int_to_ptr.vmem [resolvable:$true] %s241_s14 }
  0x14   : > { %p884_p13 = scmp.ne.s32.totalorder %s220_s11, %s883_s15  ;;  %p891_p5 = scmp.lt.s32.totalorder %s220_s11, %s220_s11 }
  0x15   : > { %p1119_p11 = pnand %p793_p9, %p1289_p1  ;;  %p892_p7 = scmp.lt.s32.totalorder %s883_s15, %s883_s15 }
  0x17   : > { %p874_p12 = pneg %p1119_p11  ;;  %p893_p10 = por %p892_p7, %p891_p5 }
  0x19   : > { %p886_p0 = pnand %p884_p13, %p874_p12 }
  0x1b   : > { %p887_p3 = pneg %p886_p0 }
  0x1d   : > { %p894_p9 = pnand %p893_p10, %p887_p3 }
  0x1f   : > { %897 = shalt.err (!%p894_p9)
}
  0x20   : > { %s1024_s16 = smov 64   ;;  %s1025_s17 = smov 4  }
  0x21   : > { %s1299_s1 = sld [smem:[#allocation12_spill]]  ;;  %s909_s20 = scalar_lea.vmem %s242_s14, 1024 }
  0x22   : > { %p910_p1 = scmp.ne.s32.totalorder %s242_s14, %s909_s20  ;;  %p917_p2 = scmp.lt.s32.totalorder %s242_s14, %s242_s14 }
  0x23   : > { %p918_p6 = scmp.lt.s32.totalorder %s909_s20, %s909_s20 }
  0x24   : > { %p912_p13 = pnand %p910_p1, %p874_p12 }
  0x25   : > { %p919_p5 = por %p918_p6, %p917_p2 }
  0x26   : > { %p913_p0 = pneg %p912_p13 }
  0x27   : > { %796 = dma.hbm_to_vmem [thread:$0]  (!%p1119_p11), %s1299_s1, 1024, %s220_s11, [#allocation6], %s1024_s16, %s1024_s16, %s1025_s17  }
  0x28   : > { %p920_p10 = pnand %p919_p5, %p913_p0 }
  0x2a   : > { %923 = shalt.err (!%p920_p10)
}
  0x2b   : > { %s1300_s5 = sld [smem:[#allocation13_spill]]  ;;  %s1142_s23 = sadd.s32 1, %s1020_s27  }
  0x2c   : > { %s31_s29 = sadd.s32 1, %s1016_s26  ;;  %s28_s10 = ssub.s32 %s1020_s27, %s1142_s23 }
  0x2d   : > { %p38_p1 = scmp.ne.s32.totalorder %s1016_s26, %s1012_s25  ;;  %p29_p2 = scmp.eq.s32.totalorder %s28_s10, 0 }
  0x2e   : > { %p39_p6 = scmp.eq.s32.totalorder %s1020_s27, 0  ;;  %p1301_p12 = scmp.eq.s32.totalorder %s1091_s28, 1 }
  0x2f   : > { %p810_p7 = scmp.lt.s32.totalorder %s1020_s27, 2  ;;  %s258_s13 = sand.u32 1, %s1016_s26  }
  0x30   : > { %p1152_p3 = por %p1301_p12, %p38_p1  ;;  %p40_p9 = por %p39_p6, %p38_p1 }
  0x31   : > { %799 = dma.hbm_to_vmem [thread:$0]  (!%p1119_p11), %s1300_s5, 1024, %s242_s14, [#allocation6], %s1024_s16, %s1024_s16, %s1025_s17  }
  0x32   : > { %s1302_s11 = scalar_select %p1152_p3, 1, 0 }
  0x33   : > { %s1158_s12 = scalar_select %p29_p2, %s1016_s26, %s31_s29  }
  0x34   : > { %s692_s15 = sshll.u32 %s258_s13, 2  ;;  %s693_s14 = sshll.u32 %s1020_s27, 6 }
  0x35   : > { %s1165_s18 = scalar_lea.hbm %s1281_s0, %s693_s14  ;;  %s262_s19 = scalar_lea.vmem [#allocation2], %s692_s15 }
  0x36   : > { %s269_s20 = sshll.u32 %s262_s19, 4  ;;  %p1167_p11 = pnand %p810_p7, %p40_p9  ;;  %s270_s20 = int_to_ptr.vmem [resolvable:$true] %s269_s20 }
  0x37   : > { %s259_s22 = scalar_lea.sflag [#allocation3], %s258_s13  ;;  %s924_s29 = scalar_lea.hbm %s1165_s18, 64 }
  0x38   : > { %p925_p13 = scmp.ne.s32.totalorder %s1165_s18, %s924_s29  ;;  %p926_p0 = pneg %p1167_p11 }
  0x39   : > { %s929_s16 = scalar_lea.hbm %s1281_s0, 128  ;;  %p930_p1 = scmp.lt.s32.totalorder %s1165_s18, %s1281_s0 }
  0x3a   : > { %p927_p5 = pnand %p926_p0, %p925_p13  ;;  %p931_p2 = scmp.lt.s32.totalorder %s929_s16, %s924_s29 }
  0x3c   : > { %p928_p10 = pneg %p927_p5  ;;  %p932_p6 = por %p931_p2, %p930_p1 }
  0x3e   : > { %p933_p12 = pnand %p932_p6, %p928_p10 }
  0x40   : > { %936 = shalt.err (!%p933_p12)
}
  0x41   : > { %s937_s19 = scalar_lea.vmem %s270_s20, 64  ;;  %s1026_s13 = smov [#allocation2]  }
  0x42   : > { %p938_p7 = scmp.ne.s32.totalorder %s270_s20, %s937_s19  ;;  %s942_s1 = sshll.u32 %s1026_s13, 4  ;;  %s943_s1 = int_to_ptr.vmem [resolvable:$false] %s942_s1 }
  0x43   : > { %s944_s5 = scalar_lea.vmem %s943_s1, 128  ;;  %p945_p13 = scmp.lt.s32.totalorder %s270_s20, %s943_s1 }
  0x44   : > { %p940_p9 = pnand %p938_p7, %p926_p0  ;;  %p946_p5 = scmp.lt.s32.totalorder %s944_s5, %s937_s19 }
  0x46   : > { %p941_p3 = pneg %p940_p9  ;;  %p947_p4 = por %p946_p5, %p945_p13 }
  0x48   : > { %p948_p8 = pnand %p947_p4, %p941_p3 }
  0x4a   : > { %951 = shalt.err (!%p948_p8)
}
  0x4b   : > { %803 = dma.hbm_to_vmem [thread:$0]  (!%p1167_p11), %s1165_s18, 64, %s270_s20, %s259_s22  }
  0x4c   : > { %p1304_p10 = scmp.ne.s32.totalorder %s1297_s9, 0 }
  0x4d   : > { %s1188_s29 = sand.u32 (!%p1304_p10), 1, %s1012_s25   ;;  %p1305_p0 = scmp.ne.s32.totalorder (!%p1304_p10), %s1295_s30, 0 }
  0x4e   : > { %278 = sbr.rel (%p1304_p10) target bundleno = 717 (0x2cd), region = 48  ;;  %s695_s10 = sshll.u32 (!%p1304_p10), %s1188_s29, 2 }
  0x4f   : > { %s281_s14 = scalar_lea.sflag (!%p1304_p10), [#allocation3], %s1188_s29  ;;  %s1192_s1 = scalar_lea.vmem (!%p1304_p10), [#allocation2], %s695_s10 }
  0x53   : > { %995 = dma.done.wait (%p1305_p0), %s281_s14, 64  }
  0x54   : > { %997 = vsyncadd (%p1305_p0), %s281_s14, 4294967232  ;;  %p1306_p4 = scmp.eq.s32.totalorder %s1091_s28, 0 }
  0x56   : > { %999 = dma.done.wait (%p1306_p4), [#allocation6], 2048   ;;  %p1307_p8 = pmov %p1306_p4 }
  0x57   : > { %v1027_v0 = vmov 0.0   ;;  %vm1028_vm0 = vmmov 0   ;;  %v852_v1 = vld [vmem:[#allocation5 + $0x38] sm:$0xff]   ;;  %v853_v2 = vld [vmem:[#allocation5 + $0x30] sm:$0xff]   ;;  %v854_v3 = vld [vmem:[#allocation5 + $0x28] sm:$0xff]   ;;  %s698_s22 = sshll.u32 %s1188_s29, 3 }
  0x58   : > { %1001 = vsyncadd (%p1307_p8), [#allocation6], 4294965248  ;;  %741 = vmatprep.subr.bf16.mxu0 %v1027_v0  ;;  %757 = vmatprep.mubr.msk.bf16.mxu0 %vm1028_vm0, %v1027_v0  ;;  %v855_v4 = vld [vmem:[#allocation5 + $0x20] sm:$0xff]   ;;  %v856_v5 = vld [vmem:[#allocation5 + $0x18] sm:$0xff]   ;;  %s720_s15 = sshll.u32 %s1091_s28, 7  ;;  %s322_s19 = scalar_lea.vmem [#allocation8], %s698_s22 }
  0x59   : > { %761 = vmatprep.subr.bf16.mxu1 %v1027_v0  ;;  %777 = vmatprep.mubr.msk.bf16.mxu1 %vm1028_vm0, %v1027_v0  ;;  %v857_v6 = vld [vmem:[#allocation5 + $0x10] sm:$0xff]   ;;  %v858_v7 = vld [vmem:[#allocation5 + $0x8] sm:$0xff]   ;;  %v859_v8 = vld [vmem:[#allocation5] sm:$0xff]   ;;  %s598_s13 = sshll.u32 %s322_s19, 4  ;;  %s585_s5 = scalar_lea.sflag [#allocation4], %s1188_s29  ;;  %s1240_s13 = int_to_ptr.vmem [resolvable:$true] %s598_s13 }
  0x5a   : > { %742 = vmatpush3.bf16.msra.mxu0 %v852_v1  ;;  %v324_v9 = vld [vmem:[%s1192_s1] sm:$0xf]  ;;  %v861_v23 = vld [vmem:[#allocation7 + $0x30] sm:$0xff]   ;;  %v862_v24 = vld [vmem:[#allocation7 + $0x28] sm:$0xff]   ;;  %s1238_s1 = scalar_lea.hbm %s1288_s7, %s720_s15  ;;  %s952_s30 = scalar_lea.vmem %s1240_s13, 128 }
  0x5b   : > { %743 = vmatprep.subr.bf16.mxu0 %v1027_v0  ;;  %v699_v10 = vld [vmem:[%s1283_s2] ss:$0 sm:$0xff]  ;;  %v863_v25 = vld [vmem:[#allocation7 + $0x20] sm:$0xff]   ;;  %v865_v27 = vld [vmem:[#allocation7 + $0x10] sm:$0xff]   ;;  %p953_p3 = scmp.ne.s32.totalorder %s1240_s13, %s952_s30  ;;  %p1308_p11 = scmp.ne.s32.totalorder %s1302_s11, 0 }
  0x5c   : > { %v860_v22 = vld [vmem:[#allocation7 + $0x38] sm:$0xff]   ;;  %v866_v28 = vld [vmem:[#allocation7 + $0x8] sm:$0xff]   ;;  %v867_v29 = vld [vmem:[#allocation7] sm:$0xff]   ;;  %s1029_s28 = smov [#allocation8]  }
  0x5d   : > { %762 = vmatpush3.bf16.msra.mxu1 %v860_v22  ;;  %v864_v26 = vld [vmem:[#allocation7 + $0x18] sm:$0xff]   ;;  %p954_p1 = pnand %p953_p3, %p1308_p11  ;;  %s956_s9 = sshll.u32 %s1029_s28, 4  ;;  %s957_s9 = int_to_ptr.vmem [resolvable:$false] %s956_s9 }
  0x5e   : > { %744 = vmatpush3.bf16.msra.mxu0 %v853_v2  ;;  %763 = vmatprep.subr.bf16.mxu1 %v1027_v0  ;;  %v708_v40 = vld [vmem:[%s1284_s3] ss:$0 sm:$0xff]  ;;  %s958_s18 = scalar_lea.vmem %s957_s9, 256  ;;  %p959_p6 = scmp.lt.s32.totalorder %s1240_s13, %s957_s9 }
  0x5f   : > { %745 = vmatprep.subr.bf16.mxu0 %v1027_v0  ;;  %v709_v42 = vld [vmem:[%s1285_s4] ss:$0 sm:$0xff]  ;;  %p955_p2 = pneg %p954_p1  ;;  %p960_p12 = scmp.lt.s32.totalorder %s958_s18, %s952_s30 }
  0x60   : > { %v710_v46 = vld [vmem:[%s1287_s6] ss:$0 sm:$0xff] }
  0x61   : > { %764 = vmatpush3.bf16.msra.mxu1 %v861_v23  ;;  %p961_p7 = por %p960_p12, %p959_p6 }
  0x62   : > { %746 = vmatpush3.bf16.msra.mxu0 %v854_v3  ;;  %765 = vmatprep.subr.bf16.mxu1 %v1027_v0 }
  0x63   : > { %747 = vmatprep.subr.bf16.mxu0 %v1027_v0  ;;  %p962_p9 = pnand %p961_p7, %p955_p2 }
  0x65   : > { %766 = vmatpush3.bf16.msra.mxu1 %v862_v24 }
  0x66   : > { %748 = vmatpush3.bf16.msra.mxu0 %v855_v4  ;;  %767 = vmatprep.subr.bf16.mxu1 %v1027_v0 }
  0x67   : > { %749 = vmatprep.subr.bf16.mxu0 %v1027_v0 }
  0x69   : > { %768 = vmatpush3.bf16.msra.mxu1 %v863_v25 }
  0x6a   : > { %750 = vmatpush3.bf16.msra.mxu0 %v856_v5  ;;  %769 = vmatprep.subr.bf16.mxu1 %v1027_v0 }
  0x6b   : > { %751 = vmatprep.subr.bf16.mxu0 %v1027_v0 }
  0x6d   : > { %770 = vmatpush3.bf16.msra.mxu1 %v864_v26 }
  0x6e   : > { %752 = vmatpush3.bf16.msra.mxu0 %v857_v6  ;;  %771 = vmatprep.subr.bf16.mxu1 %v1027_v0 }
  0x6f   : > { %753 = vmatprep.subr.bf16.mxu0 %v1027_v0 }
  0x71   : > { %772 = vmatpush3.bf16.msra.mxu1 %v865_v27 }
  0x72   : > { %754 = vmatpush3.bf16.msra.mxu0 %v858_v7  ;;  %773 = vmatprep.subr.bf16.mxu1 %v1027_v0 }
  0x73   : > { %755 = vmatprep.subr.bf16.mxu0 %v1027_v0 }
  0x75   : > { %774 = vmatpush3.bf16.msra.mxu1 %v866_v28 }
  0x76   : > { %756 = vmatpush3.bf16.msra.mxu0 %v859_v8  ;;  %775 = vmatprep.subr.bf16.mxu1 %v1027_v0 }
  0x79   : > { %758 = vmatmul.mubr.bf16.vlgmr.msra.gmra.mxu0 %v324_v9  ;;  %776 = vmatpush3.bf16.msra.mxu1 %v867_v29 }
 0x139   : > { %v430_v11 = vpop.f32.mrf.mxu0 }
 0x13a   : > { %v431_v12 = vadd.f32 %v699_v10, %v430_v11 }
 0x13b   : > { %v759_v13 = vpop.f32.mrf.mxu0 }
 0x13c   : > { %v437_v14 = vmul.f32 0.70710677, %v431_v12  ;;  %v436_v18 = vmul.f32 0.5, %v431_v12 }
 0x13d   : > { %v433_v15 = vpop.f32.mrf.mxu0 }
 0x13e   : > { %868 = verf.f32 %v437_v14 }
 0x13f   : > { %v760_v16 = vpop.f32.mrf.mxu0 }
 0x14b   : > { %v869_v17 = vpop.eup %868 }
 0x14c   : > { %v439_v19 = vadd.f32 1.0, %v869_v17 }
 0x14e   : > { %v440_v20 = vmul.f32 %v439_v19, %v436_v18 }
 0x150   : > { %441 = vadd.xlane.f32.xlu0 %v440_v20  ;;  %v444_v21 = vmul.f32 %v440_v20, %v440_v20 }
 0x154   : > { %445 = vadd.xlane.f32.xlu0 %v444_v21 }
 0x1d9   : > { %v442_v30 = vpop.xlane.xlu0 %441 }
 0x1da   : > { %v443_v31 = vmul.f32 0.03125, %v442_v30 }
 0x1dc   : > { %v448_v33 = vmul.f32 %v443_v31, %v443_v31  ;;  %v451_v38 = vsub.f32 %v440_v20, %v443_v31 }
 0x1dd   : > { %v446_v32 = vpop.xlane.xlu0 %445 }
 0x1de   : > { %v447_v34 = vmul.f32 0.03125, %v446_v32 }
 0x1e0   : > { %v449_v35 = vsub.f32 %v447_v34, %v448_v33 }
 0x1e2   : > { %v450_v36 = vmax.f32 %v449_v35, 0.0 }
 0x1e4   : > { %v452_v37 = vadd.f32 1e-12, %v450_v36 }
 0x1e6   : > { %870 = vrsqrt.f32 %v452_v37 }
 0x1f3   : > { %v871_v39 = vpop.eup %870 }
 0x1f4   : > { %v454_v41 = vmul.f32 %v871_v39, %v451_v38 }
 0x1f6   : > { %v462_v43 = vmul.f32 %v708_v40, %v454_v41 }
 0x1f8   : > { %v470_v44 = vadd.f32 %v709_v42, %v462_v43 }
 0x1fa   : > { %v471_v45 = vpack.c.bf16 %v470_v44, %v470_v44 }
 0x1fc   : > { %778 = vmatmul.mubr.bf16.vlgmr.msra.gmra.mxu1 %v471_v45 }
 0x2bc   : > { %v577_v47 = vpop.f32.mrf.mxu1 }
 0x2bd   : > { %v578_v48 = vadd.f32 %v710_v46, %v577_v47 }
 0x2be   : > { %v779_v49 = vpop.f32.mrf.mxu1 }
 0x2bf   : > { %583 = vst [vmem:[%s322_s19] sm:$0xff] %v578_v48 }
 0x2c0   : > { %v580_v50 = vpop.f32.mrf.mxu1 }
 0x2c1   : > { %965 = shalt.err (!%p962_p9)
}
 0x2c2   : > { %s966_s20 = scalar_lea.hbm %s1238_s1, 128  ;;  %s970_s22 = scalar_lea.hbm %s1288_s7, 256 }
 0x2c3   : > { %p967_p13 = scmp.ne.s32.totalorder %s1238_s1, %s966_s20  ;;  %p971_p0 = scmp.lt.s32.totalorder %s1238_s1, %s1288_s7 }
 0x2c4   : > { %p972_p4 = scmp.lt.s32.totalorder %s970_s22, %s966_s20 }
 0x2c5   : > { %p968_p5 = pnand %p967_p13, %p1308_p11 }
 0x2c6   : > { %p973_p8 = por %p972_p4, %p971_p0 }
 0x2c7   : > { %p969_p10 = pneg %p968_p5 }
 0x2c9   : > { %p974_p3 = pnand %p973_p8, %p969_p10 }
 0x2cb   : > { %977 = shalt.err (!%p974_p3)
}
 0x2cc   : > { %791 = dma.vmem_to_hbm [thread:$0]  (%p1308_p11), %s1240_s13, 128, %s1238_s1, %s585_s5   ;;  %v780_v51 = vpop.f32.mrf.mxu1 }
 0x2cd PF: > { %s610_s15 = sand.u32 1, %s1008_s24   ;;  %p1309_p1 = scmp.ne.s32.totalorder %s1296_s8, 0 }
 0x2ce   : > { %p1310_p2 = scmp.ge.s32.totalorder %s1020_s27, 2  ;;  %s611_s19 = scalar_lea.sflag [#allocation4], %s610_s15 }
 0x2d0   : > { %p805_p6 = pnand %p1310_p2, %p1309_p1 }
 0x2d2   : > { %p806_p12 = pneg %p805_p6 }
 0x2d4   : > { %1003 = dma.done.wait (%p806_p12), %s611_s19, 128  }
 0x2d5   : > { %1005 = vsyncadd (%p806_p12), %s611_s19, 4294967168  ;;  %p21_p7 = scmp.ge.s32.totalorder %s1142_s23, 4   ;;  %s1311_s24 = smov %s1012_s25 }
 0x2d6   : > { %s1312_s25 = smov %s1016_s26  ;;  %s1313_s26 = smov %s1158_s12 }
 0x2d7   : > { %s1314_s27 = smov %s1142_s23  ;;  %23 = sbr.rel (!%p21_p7) target bundleno = 9 (0x9), region = 101 }
 0x2dc   :  { %616 = vsyncpa [#allocation3], 1 }
 0x2dd   :  { %618 = vsyncpa [#allocation3 + $0x1], 1 }
 0x2de   :  { %619 = vsyncpa [#allocation6], 1 }
 0x2df   :  { %620 = vsyncpa [#allocation4], 1 }
 0x2e0   :  { %622 = vsyncpa [#allocation4 + $0x1], 1 }

</bundles_post_ra>
